<compile_context>
chip_gen: v7x
topology: tpu7x:2x2x1
jax: 0.10.0
libtpu: 0.0.40
codegen_flags: <defaults>
</compile_context>

<pallas_src>
import jax
import jax.numpy as jnp
from jax.experimental import pallas as pl
from jax.experimental.pallas import tpu as pltpu


# --------------------------------------------------------------------------- #
# Pass 1: per-(b, c) spatial sum (squeeze).
# --------------------------------------------------------------------------- #
def _sum_kernel(x_ref, sum_ref, acc_ref):
    # x_ref:   (1, C, S_tile)  current tile of x
    # sum_ref: (1, 1, C)       per-batch channel sums (written once, at the end)
    # acc_ref: (1, C) f32      VMEM accumulator, persists across grid steps
    si = pl.program_id(1)

    @pl.when(si == 0)
    def _():
        acc_ref[...] = jnp.zeros_like(acc_ref)

    acc_ref[...] += jnp.sum(x_ref[...].astype(jnp.float32), axis=-1)  # (1, C)

    @pl.when(si == pl.num_programs(1) - 1)
    def _():
        sum_ref[0] = acc_ref[...]


# --------------------------------------------------------------------------- #
# Pass 2: broadcast the channel gate over the spatial axis (scale).
# --------------------------------------------------------------------------- #
def _scale_kernel(x_ref, g_ref, o_ref):
    # x_ref: (1, C, S_tile), g_ref: (1, C, 1) -> broadcast multiply along lanes.
    o_ref[...] = x_ref[...] * g_ref[...]


# --------------------------------------------------------------------------- #
# Tile-size selection: largest 128-multiple divisor of S under a byte budget.
# --------------------------------------------------------------------------- #
def _choose_s_tile(S, C, itemsize, target_block_bytes=2 * 1024 * 1024):
    if S <= 128:
        return S
    max_tile = max(128, target_block_bytes // max(1, C * itemsize))
    best = 0
    t = 128
    while t <= min(S, max_tile):
        if S % t == 0:
            best = t
        t += 128
    if best:
        return best
    # No 128-multiple divisor of S: fall back to the largest divisor that fits.
    for t in range(min(S, max_tile), 0, -1):
        if S % t == 0:
            return t
    return S


# --------------------------------------------------------------------------- #
# Wrapper.
# --------------------------------------------------------------------------- #
def se_block(x, w1, w2):
    """x: (B, C, D, H, W); w1: (C, C//r) (in,out layout); w2: (C//r, C)."""
    B, C, D, H, W = x.shape
    S = D * H * W
    itemsize = jnp.dtype(x.dtype).itemsize
    x_flat = x.reshape(B, C, S)

    s_tile = _choose_s_tile(S, C, itemsize)
    n_s = S // s_tile

    vmem_limit = 32 * 1024 * 1024  # safe on v5e/v6e (128 MiB) and v7x (64 MiB)

    # ---- pass 1: squeeze (spatial sum) ------------------------------------- #
    sums = pl.pallas_call(
        _sum_kernel,
        out_shape=jax.ShapeDtypeStruct((B, 1, C), jnp.float32),
        grid_spec=pltpu.PrefetchScalarGridSpec(
            num_scalar_prefetch=0,
            grid=(B, n_s),
            in_specs=[pl.BlockSpec((1, C, s_tile), lambda b, si: (b, 0, si))],
            out_specs=pl.BlockSpec((1, 1, C), lambda b, si: (b, 0, 0)),
            scratch_shapes=[pltpu.VMEM((1, C), jnp.float32)],
        ),
        compiler_params=pltpu.CompilerParams(
            dimension_semantics=("parallel", "arbitrary"),
            vmem_limit_bytes=vmem_limit,
        ),
        cost_estimate=pl.CostEstimate(
            flops=B * C * S,
            transcendentals=0,
            bytes_accessed=x_flat.size * itemsize + B * C * 4,
        ),
    )(x_flat)

    # ---- excitation MLP in plain JAX (tiny; keep it off the MXU/kernel path) #
    y = sums.reshape(B, C) * (1.0 / S)                       # mean  (B, C)
    h = jnp.maximum(y @ w1.astype(jnp.float32), 0.0)         # (B, C//r)
    gate = jax.nn.sigmoid(h @ w2.astype(jnp.float32))        # (B, C)
    gate = gate.astype(x.dtype)[:, :, None]                  # (B, C, 1)

    # ---- pass 2: scale (stream x once, multiply by gate) ------------------- #
    # TODO(synk): optionally emit bf16 output on v6e/v7x to halve write traffic.
    out_flat = pl.pallas_call(
        _scale_kernel,
        out_shape=jax.ShapeDtypeStruct((B, C, S), x.dtype),
        grid_spec=pltpu.PrefetchScalarGridSpec(
            num_scalar_prefetch=0,
            grid=(B, n_s),
            in_specs=[
                pl.BlockSpec((1, C, s_tile), lambda b, si: (b, 0, si)),
                pl.BlockSpec((1, C, 1), lambda b, si: (b, 0, 0)),
            ],
            out_specs=pl.BlockSpec((1, C, s_tile), lambda b, si: (b, 0, si)),
        ),
        compiler_params=pltpu.CompilerParams(
            dimension_semantics=("parallel", "parallel"),
            vmem_limit_bytes=vmem_limit,
        ),
        cost_estimate=pl.CostEstimate(
            flops=B * C * S,
            transcendentals=0,
            bytes_accessed=2 * x_flat.size * itemsize,
        ),
    )(x_flat, gate)

    return out_flat.reshape(B, C, D, H, W)


# --------------------------------------------------------------------------- #
# Pure-JAX reference mirroring the PyTorch forward.
# --------------------------------------------------------------------------- #
def reference_se_block(x, w1, w2):
    y = jnp.mean(x, axis=(2, 3, 4))                 # (B, C)
    h = jnp.maximum(y @ w1, 0.0)                    # (B, C//r)
    s = jax.nn.sigmoid(h @ w2)                      # (B, C)
    return x * s[:, :, None, None, None]


if __name__ == "__main__":
    key = jax.random.PRNGKey(0)

    # Small shapes consistent with the module: channel=32, reduction=16 -> hidden=2
    B, C, D, H, W = 2, 32, 4, 4, 4
    reduction = 16
    Cr = C // reduction

    k_x, k_w1, k_w2 = jax.random.split(key, 3)
    x = jax.random.normal(k_x, (B, C, D, H, W), dtype=jnp.float32)
    # Weights already transposed to (in, out) layout.
    w1 = jax.random.normal(k_w1, (C, Cr), dtype=jnp.float32) * 0.1
    w2 = jax.random.normal(k_w2, (Cr, C), dtype=jnp.float32) * 0.1

    out = se_block(x, w1, w2)
    out = jax.block_until_ready(out)

    ref = reference_se_block(x, w1, w2)
    assert out.shape == x.shape
    assert jnp.allclose(out, ref, atol=1e-5, rtol=1e-5)

    print("KERNEL_OK")
</pallas_src>

<mosaic_0001>
module attributes {stable_mosaic.version = 11 : i64} {
  func.func @_sum_kernel(%arg0: i32, %arg1: i32, %arg2: memref<1x32x64xf32, #tpu.memory_space<vmem>>, %arg3: memref<1x1x32xf32, #tpu.memory_space<vmem>>, %arg4: memref<1x32xf32, #tpu.memory_space<vmem>>) attributes {dimension_semantics = [#tpu.dimension_semantics<parallel>, #tpu.dimension_semantics<arbitrary>], iteration_bounds = array<i64: 2, 1>, scalar_prefetch = 0 : i64, scratch_operands = 1 : i64, tpu.core_type = #tpu.core_type<tc>, window_params = [{transform_indices = @transform_0, window_bounds = array<i64: 1, 32, 64>}, {transform_indices = @transform_1, window_bounds = array<i64: 1, 1, 32>}]} {
    %c0_i32 = arith.constant 0 : i32
    %0 = arith.cmpi eq, %arg1, %c0_i32 : i32
    %1 = arith.extui %0 : i1 to i32
    %c0_i32_0 = arith.constant 0 : i32
    %2 = arith.cmpi ne, %1, %c0_i32_0 : i32
    scf.if %2 {
      %cst_9 = arith.constant 0.000000e+00 : f32
      %11 = vector.broadcast %cst_9 : f32 to vector<1x32xf32>
      %c0_10 = arith.constant 0 : index
      %c0_11 = arith.constant 0 : index
      %12 = vector.load %arg4[%c0_10, %c0_11] : memref<1x32xf32, #tpu.memory_space<vmem>>, vector<1x32xf32>
      tpu.vector_store %arg4[%c0_10, %c0_11], %11 {strides = array<i32>} : memref<1x32xf32, #tpu.memory_space<vmem>>, vector<1x32xf32>,
    } else {
    }
    %c0 = arith.constant 0 : index
    %c0_1 = arith.constant 0 : index
    %3 = vector.load %arg4[%c0, %c0_1] : memref<1x32xf32, #tpu.memory_space<vmem>>, vector<1x32xf32>
    %c0_2 = arith.constant 0 : index
    %c0_3 = arith.constant 0 : index
    %c0_4 = arith.constant 0 : index
    %4 = vector.load %arg2[%c0_2, %c0_3, %c0_4] : memref<1x32x64xf32, #tpu.memory_space<vmem>>, vector<1x32x64xf32>
    %cst = arith.constant dense<0.000000e+00> : vector<1x32xf32>
    %5 = vector.multi_reduction <add>, %4, %cst [2] : vector<1x32x64xf32> to vector<1x32xf32>
    %6 = arith.addf %3, %5 : vector<1x32xf32>
    %c0_5 = arith.constant 0 : index
    %c0_6 = arith.constant 0 : index
    %7 = vector.load %arg4[%c0_5, %c0_6] : memref<1x32xf32, #tpu.memory_space<vmem>>, vector<1x32xf32>
    tpu.vector_store %arg4[%c0_5, %c0_6], %6 {strides = array<i32>} : memref<1x32xf32, #tpu.memory_space<vmem>>, vector<1x32xf32>,
    %c0_i32_7 = arith.constant 0 : i32
    %8 = arith.cmpi eq, %arg1, %c0_i32_7 : i32
    %9 = arith.extui %8 : i1 to i32
    %c0_i32_8 = arith.constant 0 : i32
    %10 = arith.cmpi ne, %9, %c0_i32_8 : i32
    scf.if %10 {
      %c0_9 = arith.constant 0 : index
      %c0_10 = arith.constant 0 : index
      %11 = vector.load %arg4[%c0_9, %c0_10] : memref<1x32xf32, #tpu.memory_space<vmem>>, vector<1x32xf32>
      %c0_11 = arith.constant 0 : index
      %c0_12 = arith.constant 0 : index
      %c0_13 = arith.constant 0 : index
      %12 = vector.load %arg3[%c0_11, %c0_12, %c0_13] : memref<1x1x32xf32, #tpu.memory_space<vmem>>, vector<1x1x32xf32>
      %13 = vector.shape_cast %12 : vector<1x1x32xf32> to vector<1x32xf32>
      %14 = vector.shape_cast %11 : vector<1x32xf32> to vector<1x1x32xf32>
      tpu.vector_store %arg3[%c0_11, %c0_12, %c0_13], %14 {strides = array<i32>} : memref<1x1x32xf32, #tpu.memory_space<vmem>>, vector<1x1x32xf32>,
    } else {
    }
    return
  }
  func.func @transform_0(%arg0: i32, %arg1: i32) -> (i32, i32, i32) {
    %c0_i32 = arith.constant 0 : i32
    %c0_i32_0 = arith.constant 0 : i32
    return %arg0, %c0_i32, %arg1 : i32, i32, i32
  }
  func.func @transform_1(%arg0: i32, %arg1: i32) -> (i32, i32, i32) {
    %c0_i32 = arith.constant 0 : i32
    %c0_i32_0 = arith.constant 0 : i32
    %c0_i32_1 = arith.constant 0 : i32
    return %arg0, %c0_i32, %c0_i32_0 : i32, i32, i32
  }
}

</mosaic_0001>

<bundles_post_ra>
// kernel: tpu_custom_call.1
= control target key start
LH: loop header
LB: loop body
LE: loop exit
PB: predicated region body
PF: predicated region fallthrough
CT: control target
= control target key end

     0   :  { %6 = vsyncpa [#allocation4], 0  ;;  %s1135_s0 = inlined_call_operand.hbm [shape: f32[2,32,64], index: 0, kind: input, shape index: {}]   ;;  %s1136_s1 = inlined_call_operand.hbm [shape: f32[2,1,32], index: 1, kind: output, shape index: {}]  }
   0x1   :  { %8 = vsyncpa [#allocation4 + $0x1], 0 }
   0x2   :  { %9 = vsyncpa [#allocation5], 0 }
   0x3   :  { %11 = vsyncpa [#allocation5 + $0x1], 0  ;;  %s865_s6 = smov 0   ;;  %s867_s7 = smov 0  }
   0x4   :  { %s869_s8 = smov 0   ;;  %s871_s9 = smov 0  }
   0x5   :  { %s873_s10 = smov 0   ;;  %s875_s11 = smov 0  }
   0x6 LB: > { %s652_s12 = sadd.s32 4294967295, %s846_s11   ;;  %s653_s13 = sadd.s32 4294967294, %s846_s11   ;;  %s846_s11 = sphi %s875_s11, %s17_s11   ;;  %s842_s10 = sphi %s873_s10, %s1151_s10   ;;  %s838_s9 = sphi %s871_s9, %s1150_s9   ;;  %s834_s8 = sphi %s869_s8, %s1149_s8   ;;  %s830_s7 = sphi %s867_s7, %s1148_s7   ;;  %s826_s6 = sphi %s865_s6, %s1147_s6  }
   0x7   : > { %s29_s14 = sadd.s32 1, %s842_s10  ;;  %s38_s15 = sadd.s32 1, %s834_s8 }
   0x8   : > { %p31_p0 = scmp.ge.s32.totalorder %s29_s14, 2  ;;  %p45_p1 = scmp.ne.s32.totalorder %s834_s8, %s830_s7 }
   0x9   : > { %p46_p2 = scmp.eq.s32.totalorder %s846_s11, 0  ;;  %p51_p3 = scmp.ne.s32.totalorder %s830_s7, %s826_s6 }
   0xa   : > { %s1153_s14 = smov (%p31_p0, %s29_s14), 0  ;;  %p52_p5 = scmp.eq.s32.totalorder %s652_s12, 0 }
   0xb   : > { %p906_p4 = por %p46_p2, %p45_p1  ;;  %s33_s17 = ssub.s32 %s842_s10, %s1153_s14 }
   0xc   : > { %p75_p6 = scmp.eq.s32.totalorder %s652_s12, 1  ;;  %p36_p7 = scmp.eq.s32.totalorder %s33_s17, 0 }
   0xd   : > { %p912_p8 = por %p52_p5, %p51_p3  ;;  %p81_p10 = scmp.eq.s32.totalorder %s653_s13, 1 }
   0xe   : > { %p916_p9 = por %p75_p6, %p45_p1  ;;  %p677_p13 = scmp.lt.s32.totalorder %s846_s11, 2 }
   0xf   : > { %s921_s20 = scalar_select %p36_p7, %s834_s8, %s38_s15  }
  0x10   : > { %s1140_s19 = scalar_select %p916_p9, 1, 0 }
  0x11   : > { %p923_p11 = por %p81_p10, %p51_p3  ;;  %s101_s22 = sand.u32 1, %s834_s8  }
  0x12   : > { %s656_s23 = sshll.u32 %s101_s22, 5  ;;  %s664_s24 = sshll.u32 %s842_s10, 9 }
  0x13   : > { %s1141_s21 = scalar_select %p923_p11, 1, 0 }
  0x14   : > { %s934_s27 = scalar_lea.hbm %s1135_s0, %s664_s24  ;;  %s105_s28 = scalar_lea.vmem [#allocation3], %s656_s23 }
  0x15   : > { %s113_s29 = sshll.u32 %s105_s28, 4  ;;  %p940_p0 = pnand %p677_p13, %p906_p4  ;;  %s936_s29 = int_to_ptr.vmem [resolvable:$true] %s113_s29 }
  0x16   : > { %s945_s2 = scalar_lea.sflag [#allocation4], %s101_s22  ;;  %s734_s3 = scalar_lea.hbm %s934_s27, 512 }
  0x17   : > { %p735_p2 = scmp.ne.s32.totalorder %s934_s27, %s734_s3  ;;  %p736_p3 = pneg %p940_p0 }
  0x18   : > { %s739_s12 = scalar_lea.hbm %s1135_s0, 1024  ;;  %p740_p4 = scmp.lt.u32.totalorder %s934_s27, %s1135_s0 }
  0x19   : > { %p737_p5 = pnand %p736_p3, %p735_p2  ;;  %p741_p7 = scmp.lt.u32.totalorder %s739_s12, %s734_s3 }
  0x1a   : > { %p743_p13 = scmp.lt.u32.totalorder %s734_s3, %s934_s27 }
  0x1b   : > { %p738_p6 = pneg %p737_p5  ;;  %p742_p10 = por %p741_p7, %p740_p4 }
  0x1d   : > { %p744_p12 = por %p743_p13, %p742_p10 }
  0x1f   : > { %p745_p1 = pnand %p744_p12, %p738_p6 }
  0x21   : > { %748 = shalt.err (!%p745_p1)
}
  0x22   : > { %s749_s16 = scalar_lea.vmem %s936_s29, 512  ;;  %s848_s17 = smov [#allocation3]  }
  0x23   : > { %p750_p2 = scmp.ne.s32.totalorder %s936_s29, %s749_s16  ;;  %s754_s22 = sshll.u32 %s848_s17, 4  ;;  %s755_s22 = int_to_ptr.vmem [resolvable:$false] %s754_s22 }
  0x24   : > { %s756_s23 = scalar_lea.vmem %s755_s22, 1024  ;;  %p757_p9 = scmp.lt.s32.totalorder %s936_s29, %s755_s22 }
  0x25   : > { %p752_p5 = pnand %p750_p2, %p736_p3  ;;  %p758_p4 = scmp.lt.s32.totalorder %s756_s23, %s749_s16 }
  0x27   : > { %p753_p11 = pneg %p752_p5  ;;  %p759_p7 = por %p758_p4, %p757_p9 }
  0x29   : > { %p760_p10 = pnand %p759_p7, %p753_p11 }
  0x2b   : > { %763 = shalt.err (!%p760_p10)
}
  0x2c   : > { %s849_s24 = smov 128   ;;  %s850_s25 = smov 8  }
  0x2d   : > { %672 = dma.hbm_to_vmem [thread:$0]  (!%p940_p0), %s934_s27, 512, %s936_s29, %s945_s2, %s849_s24, %s849_s24, %s850_s25  }
  0x2e   : > { %p121_p12 = scmp.lt.s32.totalorder %s846_s11, 3  ;;  %p1143_p1 = scmp.ge.s32.totalorder %s846_s11, 1 }
  0x30   : > { %p122_p3 = pnand %p1143_p1, %p121_p12 }
  0x31   : > { %s977_s26 = sand.u32 (!%p122_p3), 1, %s830_s7  }
  0x32   : > { %125 = sbr.rel (%p122_p3) target bundleno = 389 (0x185), region = 24  ;;  %s660_s28 = sshll.u32 (!%p122_p3), %s977_s26, 5 }
  0x33   : > { %s128_s3 = scalar_lea.sflag (!%p122_p3), [#allocation4], %s977_s26  ;;  %s131_s4 = scalar_lea.vmem (!%p122_p3), [#allocation3], %s660_s28 }
  0x39   : > { %817 = dma.done.wait (%p912_p8), %s128_s3, 512  }
  0x3a   : > { %819 = vsyncadd (%p912_p8), %s128_s3, 4294966784  ;;  %vm160_vm0 = vcmask 523264   ;;  %v156_v0 = vld [vmem:[%s131_s4] sm:$0xff]  ;;  %v157_v1 = vld [vmem:[%s131_s4 + $0x8] sm:$0xff]  ;;  %v851_v8 = vmov 0   ;;  %v177_v9 = vlaneseq  ;;  %vm153_vm1 = vcmask 253952  }
  0x3b   : > { %v158_v2 = vld [vmem:[%s131_s4 + $0x10] sm:$0xff]  ;;  %v161_v3 = vsel %vm160_vm0, %v156_v0, 0.0  ;;  %v159_v5 = vld [vmem:[%s131_s4 + $0x18] sm:$0xff]  ;;  %v164_v6 = vsel %vm160_vm0, %v157_v1, 0.0  ;;  %732 = vset.pattern.permute.xlu0 %v851_v8  ;;  %733 = vset.pattern.permute.xlu1 %v851_v8  ;;  %v852_v10 = vmov 1966171168  }
  0x3c   : > { %v167_v4 = vsel %vm160_vm0, %v158_v2, 0.0  ;;  %162 = vadd.xlane.f32.xlu0 %v161_v3  ;;  %v170_v7 = vsel %vm160_vm0, %v159_v5, 0.0  ;;  %v310_v11 = vunpack.c.l.s4 %v852_v10  ;;  %v986_v12 = vshrl.u32 %v177_v9, 7  ;;  %s661_s18 = sshll.u32 %s838_s9, 4  ;;  %s148_s27 = scalar_lea.vmem [#allocation6], %s977_s26 }
  0x3d   : > { %168 = vadd.xlane.f32.xlu1 %v167_v4  ;;  %vm524_vm2 = vcmask 130112   ;;  %vm531_vm3 = vcmask 195712   ;;  %vm538_vm4 = vcmask 261312   ;;  %s576_s29 = sshll.u32 %s148_s27, 4  ;;  %s1085_s5 = scalar_lea.hbm %s1136_s1, %s661_s18  ;;  %s1087_s29 = int_to_ptr.vmem [resolvable:$true] %s576_s29 }
  0x3e   : > { %v311_v13 = vunpack.c.0.s8 %v310_v11  ;;  %v989_v14 = vsub.s32 0, %v986_v12  ;;  %v992_v15 = vsub.s32 1, %v986_v12  ;;  %v995_v16 = vsub.s32 2, %v986_v12  ;;  %s564_s12 = scalar_lea.sflag [#allocation5], %s977_s26  ;;  %s764_s13 = scalar_lea.vmem %s1087_s29, 16 }
  0x3f   : > { %v998_v17 = vsub.s32 3, %v986_v12  ;;  %v1001_v18 = vsub.s32 4, %v986_v12  ;;  %v1004_v19 = vsub.s32 5, %v986_v12  ;;  %v1007_v20 = vsub.s32 6, %v986_v12  ;;  %p765_p8 = scmp.ne.s32.totalorder %s1087_s29, %s764_s13  ;;  %p1144_p9 = scmp.ne.s32.totalorder %s1140_s19, 0 }
  0x40   : > { %165 = vadd.xlane.f32.xlu0 %v164_v6  ;;  %v1010_v21 = vsub.s32 7, %v986_v12  ;;  %v1013_v24 = vsub.s32 %v311_v13, %v986_v12  ;;  %s854_s9 = smov [#allocation6]  }
  0x41   : > { %171 = vadd.xlane.f32.xlu1 %v170_v7  ;;  %p766_p11 = pnand %p765_p8, %p1144_p9  ;;  %s768_s15 = sshll.u32 %s854_s9, 4  ;;  %s769_s15 = int_to_ptr.vmem [resolvable:$false] %s768_s15 }
  0x42   : > { %s770_s16 = scalar_lea.vmem %s769_s15, 32  ;;  %p771_p6 = scmp.lt.s32.totalorder %s1087_s29, %s769_s15 }
  0x43   : > { %p767_p0 = pneg %p766_p11  ;;  %p772_p13 = scmp.lt.s32.totalorder %s770_s16, %s764_s13 }
  0x45   : > { %p773_p2 = por %p772_p13, %p771_p6 }
  0x47   : > { %p774_p5 = pnand %p773_p2, %p767_p0 }
  0xc9   : > { %v163_v22 = vpop.xlane.xlu0 %162 }
  0xca   : > { %v169_v23 = vpop.xlane.xlu1 %168  ;;  %v180_v25 = vrot.slane %v163_v22, %v989_v14  ;;  %v184_v26 = vrot.slane %v163_v22, %v992_v15  ;;  %v188_v27 = vrot.slane %v163_v22, %v995_v16  ;;  %v192_v28 = vrot.slane %v163_v22, %v998_v17 }
  0xcb   : > { %v196_v29 = vrot.slane %v163_v22, %v1001_v18  ;;  %v200_v30 = vrot.slane %v163_v22, %v1004_v19  ;;  %v204_v31 = vrot.slane %v163_v22, %v1007_v20  ;;  %v208_v32 = vrot.slane %v163_v22, %v1010_v21 }
  0xcc   : > { %v305_v33 = vcombine.low %v180_v25, %v184_v26  ;;  %v306_v34 = vcombine.low %v188_v27, %v192_v28  ;;  %v244_v35 = vrot.slane %v169_v23, %v989_v14  ;;  %v248_v36 = vrot.slane %v169_v23, %v992_v15 }
  0xcd   : > { %v166_v37 = vpop.xlane.xlu0 %165  ;;  %v307_v38 = vcombine.low %v196_v29, %v200_v30  ;;  %v308_v39 = vcombine.low %v204_v31, %v208_v32  ;;  %v252_v40 = vrot.slane %v169_v23, %v995_v16  ;;  %v256_v41 = vrot.slane %v169_v23, %v998_v17 }
  0xce   : > { %v315_v42 = vrot.slane %v305_v33, %v1013_v24  ;;  %v322_v43 = vrot.slane %v306_v34, %v1013_v24  ;;  %v212_v44 = vrot.slane %v166_v37, %v989_v14  ;;  %v216_v45 = vrot.slane %v166_v37, %v992_v15  ;;  %v172_v62 = vpop.xlane.xlu1 %171 }
  0xcf   : > { %v329_v46 = vrot.slane %v307_v38, %v1013_v24  ;;  %v336_v47 = vrot.slane %v308_v39, %v1013_v24  ;;  %v220_v48 = vrot.slane %v166_v37, %v995_v16  ;;  %v224_v49 = vrot.slane %v166_v37, %v998_v17 }
  0xd0   : > { %v337_v50 = vcombine.low %v315_v42, %v322_v43  ;;  %v228_v51 = vrot.slane %v166_v37, %v1001_v18  ;;  %v232_v52 = vrot.slane %v166_v37, %v1004_v19  ;;  %v236_v53 = vrot.slane %v166_v37, %v1007_v20 }
  0xd1   : > { %v338_v54 = vcombine.low %v329_v46, %v336_v47  ;;  %v240_v55 = vrot.slane %v166_v37, %v1010_v21  ;;  %v354_v56 = vcombine.low %v212_v44, %v216_v45  ;;  %v355_v57 = vcombine.low %v220_v48, %v224_v49 }
  0xd2   : > { %v345_v58 = vrot.slane %v337_v50, %v1013_v24  ;;  %v356_v59 = vcombine.low %v228_v51, %v232_v52  ;;  %v260_v60 = vrot.slane %v169_v23, %v1001_v18  ;;  %v264_v61 = vrot.slane %v169_v23, %v1004_v19 }
  0xd3   : > { %v352_v63 = vrot.slane %v338_v54, %v1013_v24  ;;  %v357_v0 = vcombine.low %v236_v53, %v240_v55  ;;  %v364_v1 = vrot.slane %v354_v56, %v1013_v24  ;;  %v371_v2 = vrot.slane %v355_v57, %v1013_v24 }
  0xd4   : > { %v378_v3 = vrot.slane %v356_v59, %v1013_v24  ;;  %v268_v4 = vrot.slane %v169_v23, %v1007_v20  ;;  %v272_v5 = vrot.slane %v169_v23, %v1010_v21  ;;  %v403_v6 = vcombine.low %v244_v35, %v248_v36 }
  0xd5   : > { %v353_v7 = vcombine.low %v345_v58, %v352_v63  ;;  %v385_v8 = vrot.slane %v357_v0, %v1013_v24  ;;  %v386_v10 = vcombine.low %v364_v1, %v371_v2  ;;  %v404_v11 = vcombine.low %v252_v40, %v256_v41 }
  0xd6   : > { %v405_v13 = vcombine.low %v260_v60, %v264_v61  ;;  %v406_v22 = vcombine.low %v268_v4, %v272_v5  ;;  %v413_v25 = vrot.slane %v403_v6, %v1013_v24  ;;  %v276_v26 = vrot.slane %v172_v62, %v989_v14 }
  0xd7   : > { %502 = vperm.xlu0 %732, %v353_v7   ;;  %v387_v27 = vcombine.low %v378_v3, %v385_v8  ;;  %v394_v28 = vrot.slane %v386_v10, %v1013_v24  ;;  %v420_v29 = vrot.slane %v404_v11, %v1013_v24  ;;  %v280_v23 = vrot.slane %v172_v62, %v992_v15 }
  0xd8   : > { %v427_v30 = vrot.slane %v405_v13, %v1013_v24  ;;  %v434_v31 = vrot.slane %v406_v22, %v1013_v24  ;;  %v284_v32 = vrot.slane %v172_v62, %v995_v16  ;;  %v288_v33 = vrot.slane %v172_v62, %v998_v17 }
  0xd9   : > { %v401_v34 = vrot.slane %v387_v27, %v1013_v24  ;;  %v435_v35 = vcombine.low %v413_v25, %v420_v29  ;;  %v292_v14 = vrot.slane %v172_v62, %v1001_v18  ;;  %v296_v36 = vrot.slane %v172_v62, %v1004_v19 }
  0xda   : > { %v436_v37 = vcombine.low %v427_v30, %v434_v31  ;;  %v300_v38 = vrot.slane %v172_v62, %v1007_v20  ;;  %v304_v15 = vrot.slane %v172_v62, %v1010_v21  ;;  %v452_v39 = vcombine.low %v276_v26, %v280_v23 }
  0xdb   : > { %v402_v40 = vcombine.low %v394_v28, %v401_v34  ;;  %v443_v41 = vrot.slane %v435_v35, %v1013_v24  ;;  %v453_v42 = vcombine.low %v284_v32, %v288_v33  ;;  %v454_v16 = vcombine.low %v292_v14, %v296_v36 }
  0xdc   : > { %v450_v17 = vrot.slane %v436_v37, %v1013_v24  ;;  %v455_v43 = vcombine.low %v300_v38, %v304_v15  ;;  %v462_v44 = vrot.slane %v452_v39, %v1013_v24  ;;  %v853_v50 = vmov 0.0  }
  0xdd   : > { %505 = vperm.xlu1 %733, %v402_v40   ;;  %v469_v18 = vrot.slane %v453_v42, %v1013_v24  ;;  %v476_v19 = vrot.slane %v454_v16, %v1013_v24  ;;  %154 = vst.msk [vmem:[#allocation2] sm:$0x1] %vm153_vm1, %v853_v50  ;;  %v514_v51 = vand.u32 127, %v177_v9 }
  0xde   : > { %v451_v45 = vcombine.low %v443_v41, %v450_v17  ;;  %v483_v20 = vrot.slane %v455_v43, %v1013_v24 }
  0xdf   : > { %v484_v21 = vcombine.low %v462_v44, %v469_v18  ;;  %v519_v52 = vadd.s32 4294967288, %v514_v51  ;;  %v526_v53 = vadd.s32 4294967280, %v514_v51  ;;  %v533_v56 = vadd.s32 4294967272, %v514_v51 }
  0xe0   : > { %v485_v46 = vcombine.low %v476_v19, %v483_v20  ;;  %v517_v58 = vsub.s32 %v514_v51, %v986_v12 }
  0xe1   : > { %508 = vperm.xlu1 %733, %v451_v45   ;;  %v492_v47 = vrot.slane %v484_v21, %v1013_v24  ;;  %v522_v55 = vsub.s32 %v519_v52, %v986_v12  ;;  %v529_v57 = vsub.s32 %v526_v53, %v986_v12  ;;  %v536_v62 = vsub.s32 %v533_v56, %v986_v12 }
  0xe2   : > { %v499_v48 = vrot.slane %v485_v46, %v1013_v24 }
  0xe4   : > { %v500_v49 = vcombine.low %v492_v47, %v499_v48  ;;  %v155_v6 = vld [vmem:[#allocation2] sm:$0x1] }
  0xe6   : > { %511 = vperm.xlu1 %733, %v500_v49  }
 0x156   : > { %v503_v60 = vpop.permute.xlu0 %502 }
 0x157   : > { %v518_v9 = vrot.slane %v503_v60, %v517_v58 }
 0x15c   : > { %v506_v54 = vpop.permute.xlu1 %505 }
 0x15d   : > { %v523_v61 = vrot.slane %v506_v54, %v522_v55 }
 0x15f   : > { %v525_v1 = vsel %vm524_vm2, %v523_v61, %v518_v9 }
 0x160   : > { %v509_v59 = vpop.permute.xlu1 %508 }
 0x161   : > { %v530_v63 = vrot.slane %v509_v59, %v529_v57 }
 0x163   : > { %v532_v3 = vsel %vm531_vm3, %v530_v63, %v525_v1 }
 0x165   : > { %v512_v0 = vpop.permute.xlu1 %511 }
 0x166   : > { %v537_v2 = vrot.slane %v512_v0, %v536_v62 }
 0x168   : > { %v539_v4 = vsel %vm538_vm4, %v537_v2, %v532_v3 }
 0x169   : > { %v546_v5 = vrot.slane %v539_v4, %v1013_v24 }
 0x16b   : > { %v553_v7 = vrot.slane %v546_v5, %v1013_v24 }
 0x16d   : > { %v555_v12 = vadd.f32 %v553_v7, %v155_v6 }
 0x16f   : > { %557 = vst.msk [vmem:[#allocation2] sm:$0x1] %vm153_vm1, %v555_v12 }
 0x176   : > { %v561_v8 = vld [vmem:[#allocation2] sm:$0x1] }
 0x177   : > { %562 = vst.msk [vmem:[%s148_s27] sm:$0x1] %vm153_vm1, %v561_v8 }
 0x178   : > { %777 = shalt.err (!%p774_p5)
}
 0x179   : > { %s778_s17 = scalar_lea.hbm %s1085_s5, 16  ;;  %s782_s24 = scalar_lea.hbm %s1136_s1, 32 }
 0x17a   : > { %p779_p4 = scmp.ne.s32.totalorder %s1085_s5, %s778_s17  ;;  %p783_p12 = scmp.lt.u32.totalorder %s1085_s5, %s1136_s1 }
 0x17b   : > { %p784_p1 = scmp.lt.u32.totalorder %s782_s24, %s778_s17  ;;  %p786_p8 = scmp.lt.u32.totalorder %s778_s17, %s1085_s5 }
 0x17c   : > { %p780_p7 = pnand %p779_p4, %p1144_p9 }
 0x17d   : > { %p785_p3 = por %p784_p1, %p783_p12 }
 0x17e   : > { %p781_p10 = pneg %p780_p7 }
 0x17f   : > { %p787_p11 = por %p786_p8, %p785_p3 }
 0x181   : > { %p788_p0 = pnand %p787_p11, %p781_p10 }
 0x183   : > { %791 = shalt.err (!%p788_p0)
}
 0x184   : > { %667 = dma.vmem_to_hbm [thread:$0]  (%p1144_p9), %s1087_s29, 16, %s1085_s5, %s564_s12  }
 0x185 PF: > { %s588_s28 = sand.u32 1, %s826_s6   ;;  %p1145_p6 = scmp.ne.s32.totalorder %s1141_s21, 0 }
 0x186   : > { %p1146_p13 = scmp.ge.s32.totalorder %s846_s11, 2  ;;  %s589_s3 = scalar_lea.sflag [#allocation5], %s588_s28 }
 0x188   : > { %p674_p2 = pnand %p1146_p13, %p1145_p6 }
 0x18a   : > { %821 = dma.done.wait (!%p674_p2), %s589_s3, 16  }
 0x18b   : > { %823 = vsyncadd (!%p674_p2), %s589_s3, 4294967280  ;;  %s17_s11 = sadd.s32 1, %s846_s11   ;;  %s1147_s6 = smov %s830_s7 }
 0x18c   : > { %p14_p5 = scmp.ge.s32.totalorder %s17_s11, 4   ;;  %s1148_s7 = smov %s834_s8 }
 0x18d   : > { %s1149_s8 = smov %s921_s20  ;;  %s1150_s9 = smov %s842_s10 }
 0x18e   : > { %s1151_s10 = smov %s1153_s14  ;;  %16 = sbr.rel (!%p14_p5) target bundleno = 6 (0x6), region = 77 }
 0x195   :  { %593 = vsyncpa [#allocation4], 1 }
 0x196   :  { %595 = vsyncpa [#allocation4 + $0x1], 1 }
 0x197   :  { %596 = vsyncpa [#allocation5], 1 }
 0x198   :  { %598 = vsyncpa [#allocation5 + $0x1], 1 }

</bundles_post_ra>
